<compile_context>
chip_gen: v7x
topology: tpu7x:2x2x1
jax: 0.10.0
libtpu: 0.0.40
codegen_flags: <defaults>
</compile_context>

<pallas_src>
import jax
import jax.numpy as jnp
from jax.experimental import pallas as pl
from jax.experimental.pallas import tpu as pltpu


def _round_up(a, m):
    return ((a + m - 1) // m) * m


def _vmem_budget_bytes():
    """Generation-aware usable-VMEM budget (per TensorCore), with headroom."""
    cap = None
    try:
        info = pltpu.get_tpu_info()
        cap = int(getattr(info, "vmem_capacity_bytes", 0)) or None
    except Exception:
        cap = None
    if cap is None:
        cap = 64 << 20  # conservative fallback: assume v7x per-TC VMEM
    # ~18% headroom for compiler/internal scratch and semaphores:
    #   128 MiB (v5e/v6e) -> ~105 MiB ; 64 MiB (v7x per-TC) -> ~52 MiB.
    return int(cap * 0.82)


def _mlm_pred_kernel(x_ref, w1_ref, b1_ref, w2_ref, b2_ref, o_ref, h_ref):
    # x_ref : [TN, E]    w1_ref: [E, Hp]    b1_ref: [1, Hp] (f32)
    # w2_ref: [Hp, TO]   b2_ref: [1, TO]    o_ref : [TN, TO]
    # h_ref : [TN, Hp]   VMEM scratch, persists across the inner (column) axis.
    j = pl.program_id(1)

    @pl.when(j == 0)
    def _():
        # projection: x @ W1 on the MXU (f32 accumulation) + bias, then tanh
        # (EUP, f32).  Computed once per row tile and reused for every
        # output-column tile.
        proj = jnp.dot(x_ref[...], w1_ref[...],
                       preferred_element_type=jnp.float32)
        h = jnp.tanh(proj + b1_ref[...])
        # TODO(synk): training-mode dropout (pltpu.prng_random_bits mask)
        # omitted; eval-mode dropout is identity.
        h_ref[...] = h.astype(h_ref.dtype)

    # fc: h @ W2 (MXU, f32 accumulation) + bias for this output-column tile.
    out = jnp.dot(h_ref[...], w2_ref[...], preferred_element_type=jnp.float32)
    o_ref[...] = (out + b2_ref[...]).astype(o_ref.dtype)


def prepare_mlm_params(w1, b1, w2, b2, *, use_bf16_mxu=False):
    """Pad/stage the Linear weights once (hoisted out of the forward path).

    w1: [E, H]   b1: [H] or [1, H]   w2: [H, O]   b2: [O] or [1, O]
    use_bf16_mxu: cast weights to bf16 for full-rate MXU (numerics-visible).
    """
    E, H = w1.shape
    O = w2.shape[1]
    Hp = _round_up(H, 128)
    Op = _round_up(O, 128)
    w_dtype = jnp.bfloat16 if use_bf16_mxu else w1.dtype
    w1p = jnp.zeros((E, Hp), w_dtype).at[:, :H].set(w1.astype(w_dtype))
    w2p = jnp.zeros((Hp, Op), w_dtype).at[:H, :O].set(w2.astype(w_dtype))
    b1p = jnp.zeros((1, Hp), jnp.float32).at[:, :H].set(
        b1.reshape(1, -1).astype(jnp.float32))
    b2p = jnp.zeros((1, Op), jnp.float32).at[:, :O].set(
        b2.reshape(1, -1).astype(jnp.float32))
    return {"w1": w1p, "b1": b1p, "w2": w2p, "b2": b2p, "H": H, "O": O}


def mlm_prediction_forward(x, params, *, to_target=512, tn_cap=2048,
                           vmem_budget_bytes=None):
    """x: [..., E]; params from prepare_mlm_params.  Returns [..., O], x.dtype."""
    orig_shape = x.shape
    E = orig_shape[-1]
    out_dtype = x.dtype

    w1p, b1p, w2p, b2p = params["w1"], params["b1"], params["w2"], params["b2"]
    O = params["O"]
    Hp, Op = w1p.shape[1], w2p.shape[1]

    x2d = x.reshape(-1, E)
    N = x2d.shape[0]
    # bf16 MXU path: if the weights were staged in bf16 and x is f32, feed the
    # MXU bf16 operands (accumulation stays f32; output stays x.dtype).
    if w1p.dtype == jnp.bfloat16 and x2d.dtype == jnp.float32:
        x2d = x2d.astype(jnp.bfloat16)
    h_dtype = w2p.dtype  # second matmul's LHS operand dtype

    # ---- generation-aware VMEM budget (per TensorCore) ----------------------
    hw_budget = _vmem_budget_bytes()
    budget = vmem_budget_bytes if vmem_budget_bytes is not None else hw_budget

    x_sz = jnp.dtype(x2d.dtype).itemsize
    w_sz = jnp.dtype(w1p.dtype).itemsize
    o_sz = jnp.dtype(out_dtype).itemsize
    h_sz = jnp.dtype(h_dtype).itemsize
    w1_res = E * Hp * w_sz + Hp * 4  # w1 + b1, resident, single-buffered

    def _vmem_need(tn, to, w2_res):
        b = 2 * tn * E * x_sz              # streamed x row tile (double buffer)
        b += 2 * tn * to * o_sz            # output tile (double buffer)
        b += tn * Hp * h_sz                # h scratch
        b += tn * Hp * 4 + tn * to * 4     # in-kernel f32 intermediates
        b += w1_res
        if w2_res:
            b += Hp * Op * w_sz + Op * 4   # resident w2/b2 (single buffer)
        else:
            b += 2 * (Hp * to * w_sz + to * 4)  # streamed w2/b2 column tiles
        return b

    # ---- output-column tiling ------------------------------------------------
    # Keep w2 resident when the whole padded [Hp, Op] matrix fits next to a
    # minimal row pipeline; otherwise stream lane-dense TO-wide column tiles
    # along an inner "arbitrary" grid axis (w2 read straight from HBM).
    if _vmem_need(128, Op, True) <= budget:
        TO, w2_resident = Op, True
    else:
        w2_resident = False
        TO = 128
        for cand in range(min(_round_up(to_target, 128), Op), 127, -128):
            if Op % cand == 0 and _vmem_need(128, cand, False) <= budget:
                TO = cand
                break
    n_col = Op // TO

    # ---- row tiling ------------------------------------------------------------
    n_al = _round_up(N, 8)                       # sublane multiple
    tn_max = 128
    for cand in range(_round_up(tn_cap, 128), 0, -128):
        if _vmem_need(cand, TO, w2_resident) <= budget:
            tn_max = cand
            break
    if n_al <= tn_max:
        TN = n_al                                # single row tile, zero waste
    else:
        TN = 128
        for cand in range(tn_max, 127, -128):    # largest tile, bounded tail waste
            waste = _round_up(n_al, cand) - n_al
            if waste <= max(n_al // 8, 128):
                TN = cand
                break
    Np = _round_up(n_al, TN)
    n_row = Np // TN

    if Np == N:
        x_pad = x2d
    else:
        x_pad = jnp.zeros((Np, E), x2d.dtype).at[:N, :].set(x2d)

    vmem_limit = hw_budget  # request the full generation-aware budget

    def _build(single_buffer):
        def spec(shape, index_map, invariant):
            if single_buffer and invariant:
                return pl.BlockSpec(shape, index_map,
                                    pipeline_mode=pl.Buffered(1))
            return pl.BlockSpec(shape, index_map)

        return pl.pallas_call(
            _mlm_pred_kernel,
            out_shape=jax.ShapeDtypeStruct((Np, Op), out_dtype),
            grid_spec=pltpu.PrefetchScalarGridSpec(
                num_scalar_prefetch=0,
                grid=(n_row, n_col),
                in_specs=[
                    spec((TN, E), lambda i, j: (i, 0), invariant=(n_row == 1)),
                    spec((E, Hp), lambda i, j: (0, 0), invariant=True),
                    spec((1, Hp), lambda i, j: (0, 0), invariant=True),
                    spec((Hp, TO), lambda i, j: (0, j), invariant=(n_col == 1)),
                    spec((1, TO), lambda i, j: (0, j), invariant=(n_col == 1)),
                ],
                out_specs=pl.BlockSpec((TN, TO), lambda i, j: (i, j)),
                scratch_shapes=[pltpu.VMEM((TN, Hp), h_dtype)],
            ),
            compiler_params=pltpu.CompilerParams(
                dimension_semantics=("parallel", "arbitrary"),
                vmem_limit_bytes=vmem_limit,
            ),
        )

    try:
        out2d = _build(True)(x_pad, w1p, b1p, w2p, b2p)
    except Exception:
        # Fallback for Pallas versions that reject single-buffer pipeline_mode.
        out2d = _build(False)(x_pad, w1p, b1p, w2p, b2p)

    # Padded rows carry tanh(b1)@W2 + b2 garbage; slicing them (and the padded
    # output columns) off is required for correctness.
    return out2d[:N, :O].reshape(*orig_shape[:-1], O)


def mlm_prediction_layer(x, w1, b1, w2, b2, **kwargs):
    """One-shot convenience wrapper (pads weights on every call; prefer
    prepare_mlm_params + mlm_prediction_forward in a real model)."""
    use_bf16 = kwargs.pop("use_bf16_mxu", False)
    params = prepare_mlm_params(w1, b1, w2, b2, use_bf16_mxu=use_bf16)
    return mlm_prediction_forward(x, params, **kwargs)


if __name__ == "__main__":
    key = jax.random.PRNGKey(0)

    # ---- test 1: small shapes consistent with the module's forward ----------
    B, S = 2, 8
    embedding_dim, hidden_dim, output_dim = 32, 64, 48
    kx, kw1, kb1, kw2, kb2, key = jax.random.split(key, 6)

    x = jax.random.normal(kx, (B, S, embedding_dim), dtype=jnp.float32)
    bound1 = 1.0 / (embedding_dim ** 0.5)
    w1 = jax.random.uniform(kw1, (embedding_dim, hidden_dim),
                            minval=-bound1, maxval=bound1, dtype=jnp.float32)
    b1 = jax.random.uniform(kb1, (hidden_dim,),
                            minval=-bound1, maxval=bound1, dtype=jnp.float32)
    bound2 = 1.0 / (hidden_dim ** 0.5)
    w2 = jax.random.uniform(kw2, (hidden_dim, output_dim),
                            minval=-bound2, maxval=bound2, dtype=jnp.float32)
    b2 = jax.random.uniform(kb2, (output_dim,),
                            minval=-bound2, maxval=bound2, dtype=jnp.float32)

    params = prepare_mlm_params(w1, b1, w2, b2)   # pad once, not per forward
    y = mlm_prediction_forward(x, params)
    y = jax.block_until_ready(y)

    ref = jnp.tanh(x @ w1 + b1) @ w2 + b2          # dropout = identity (eval)
    assert y.shape == (B, S, output_dim)
    assert y.dtype == x.dtype
    assert jnp.allclose(y, ref, atol=1e-5, rtol=1e-5)

    # ---- test 2: exercise the multi-tile path (streamed w2, row tiling) -----
    B2, S2, E2, H2, O2 = 2, 200, 32, 64, 384
    kx2, kw3, kb3, kw4, kb4, key = jax.random.split(key, 6)
    x2 = jax.random.normal(kx2, (B2, S2, E2), dtype=jnp.float32)
    w3 = jax.random.uniform(kw3, (E2, H2), minval=-0.17, maxval=0.17,
                            dtype=jnp.float32)
    b3 = jax.random.uniform(kb3, (H2,), minval=-0.17, maxval=0.17,
                            dtype=jnp.float32)
    w4 = jax.random.uniform(kw4, (H2, O2), minval=-0.12, maxval=0.12,
                            dtype=jnp.float32)
    b4 = jax.random.uniform(kb4, (O2,), minval=-0.12, maxval=0.12,
                            dtype=jnp.float32)
    params2 = prepare_mlm_params(w3, b3, w4, b4)
    # Tiny artificial tiling budget -> forces streamed w2 column tiles and a
    # multi-row-tile grid (still correct; only tiling changes).
    y2 = mlm_prediction_forward(x2, params2, vmem_budget_bytes=768 * 1024)
    y2 = jax.block_until_ready(y2)
    ref2 = jnp.tanh(x2 @ w3 + b3) @ w4 + b4
    assert y2.shape == (B2, S2, O2)
    assert jnp.allclose(y2, ref2, atol=1e-5, rtol=1e-5)

    print("KERNEL_OK")
</pallas_src>

<mosaic_0001>
module attributes {stable_mosaic.version = 11 : i64} {
  func.func @_mlm_pred_kernel(%arg0: i32, %arg1: i32, %arg2: memref<16x32xf32, #tpu.memory_space<vmem>>, %arg3: memref<32x128xf32, #tpu.memory_space<vmem>>, %arg4: memref<1x128xf32, #tpu.memory_space<vmem>>, %arg5: memref<128x128xf32, #tpu.memory_space<vmem>>, %arg6: memref<1x128xf32, #tpu.memory_space<vmem>>, %arg7: memref<16x128xf32, #tpu.memory_space<vmem>>, %arg8: memref<16x128xf32, #tpu.memory_space<vmem>>) attributes {dimension_semantics = [#tpu.dimension_semantics<parallel>, #tpu.dimension_semantics<arbitrary>], iteration_bounds = array<i64: 1, 1>, scalar_prefetch = 0 : i64, scratch_operands = 1 : i64, tpu.core_type = #tpu.core_type<tc>, window_params = [{pipeline_mode = #tpu.pipeline_mode<synchronous>, transform_indices = @transform_0, window_bounds = array<i64: 16, 32>}, {pipeline_mode = #tpu.pipeline_mode<synchronous>, transform_indices = @transform_1, window_bounds = array<i64: 32, 128>}, {pipeline_mode = #tpu.pipeline_mode<synchronous>, transform_indices = @transform_2, window_bounds = array<i64: 1, 128>}, {pipeline_mode = #tpu.pipeline_mode<synchronous>, transform_indices = @transform_3, window_bounds = array<i64: 128, 128>}, {pipeline_mode = #tpu.pipeline_mode<synchronous>, transform_indices = @transform_4, window_bounds = array<i64: 1, 128>}, {transform_indices = @transform_5, window_bounds = array<i64: 16, 128>}]} {
    %c0_i32 = arith.constant 0 : i32
    %0 = arith.cmpi eq, %arg1, %c0_i32 : i32
    %1 = arith.extui %0 : i1 to i32
    %c0_i32_0 = arith.constant 0 : i32
    %2 = arith.cmpi ne, %1, %c0_i32_0 : i32
    scf.if %2 {
      %c0_8 = arith.constant 0 : index
      %c0_9 = arith.constant 0 : index
      %10 = vector.load %arg2[%c0_8, %c0_9] : memref<16x32xf32, #tpu.memory_space<vmem>>, vector<16x32xf32>
      %c0_10 = arith.constant 0 : index
      %c0_11 = arith.constant 0 : index
      %11 = vector.load %arg3[%c0_10, %c0_11] : memref<32x128xf32, #tpu.memory_space<vmem>>, vector<32x128xf32>
      %cst_12 = arith.constant dense<0.000000e+00> : vector<16x128xf32>
      %12 = tpu.matmul %10, %11, %cst_12 {dimension_numbers = #tpu.dot_dimension_numbers<[1], [0], [0], [1], [0, 0, 1, 1], [], []>} : vector<16x32xf32>, vector<32x128xf32>, vector<16x128xf32> -> vector<16x128xf32>
      %c0_13 = arith.constant 0 : index
      %c0_14 = arith.constant 0 : index
      %13 = vector.load %arg4[%c0_13, %c0_14] : memref<1x128xf32, #tpu.memory_space<vmem>>, vector<1x128xf32>
      %14 = vector.broadcast %13 : vector<1x128xf32> to vector<16x128xf32>
      %15 = arith.addf %12, %14 : vector<16x128xf32>
      %16 = math.tanh %15 : vector<16x128xf32>
      %c0_15 = arith.constant 0 : index
      %c0_16 = arith.constant 0 : index
      %17 = vector.load %arg8[%c0_15, %c0_16] : memref<16x128xf32, #tpu.memory_space<vmem>>, vector<16x128xf32>
      tpu.vector_store %arg8[%c0_15, %c0_16], %16 {strides = array<i32>} : memref<16x128xf32, #tpu.memory_space<vmem>>, vector<16x128xf32>,
    } else {
    }
    %c0 = arith.constant 0 : index
    %c0_1 = arith.constant 0 : index
    %3 = vector.load %arg8[%c0, %c0_1] : memref<16x128xf32, #tpu.memory_space<vmem>>, vector<16x128xf32>
    %c0_2 = arith.constant 0 : index
    %c0_3 = arith.constant 0 : index
    %4 = vector.load %arg5[%c0_2, %c0_3] : memref<128x128xf32, #tpu.memory_space<vmem>>, vector<128x128xf32>
    %cst = arith.constant dense<0.000000e+00> : vector<16x128xf32>
    %5 = tpu.matmul %3, %4, %cst {dimension_numbers = #tpu.dot_dimension_numbers<[1], [0], [0], [1], [0, 0, 1, 1], [], []>} : vector<16x128xf32>, vector<128x128xf32>, vector<16x128xf32> -> vector<16x128xf32>
    %c0_4 = arith.constant 0 : index
    %c0_5 = arith.constant 0 : index
    %6 = vector.load %arg6[%c0_4, %c0_5] : memref<1x128xf32, #tpu.memory_space<vmem>>, vector<1x128xf32>
    %7 = vector.broadcast %6 : vector<1x128xf32> to vector<16x128xf32>
    %8 = arith.addf %5, %7 : vector<16x128xf32>
    %c0_6 = arith.constant 0 : index
    %c0_7 = arith.constant 0 : index
    %9 = vector.load %arg7[%c0_6, %c0_7] : memref<16x128xf32, #tpu.memory_space<vmem>>, vector<16x128xf32>
    tpu.vector_store %arg7[%c0_6, %c0_7], %8 {strides = array<i32>} : memref<16x128xf32, #tpu.memory_space<vmem>>, vector<16x128xf32>,
    return
  }
  func.func @transform_0(%arg0: i32, %arg1: i32) -> (i32, i32) {
    %c0_i32 = arith.constant 0 : i32
    %c0_i32_0 = arith.constant 0 : i32
    return %arg0, %c0_i32 : i32, i32
  }
  func.func @transform_1(%arg0: i32, %arg1: i32) -> (i32, i32) {
    %c0_i32 = arith.constant 0 : i32
    %c0_i32_0 = arith.constant 0 : i32
    %c0_i32_1 = arith.constant 0 : i32
    return %c0_i32, %c0_i32_0 : i32, i32
  }
  func.func @transform_2(%arg0: i32, %arg1: i32) -> (i32, i32) {
    %c0_i32 = arith.constant 0 : i32
    %c0_i32_0 = arith.constant 0 : i32
    %c0_i32_1 = arith.constant 0 : i32
    return %c0_i32, %c0_i32_0 : i32, i32
  }
  func.func @transform_3(%arg0: i32, %arg1: i32) -> (i32, i32) {
    %c0_i32 = arith.constant 0 : i32
    %c0_i32_0 = arith.constant 0 : i32
    return %c0_i32, %arg1 : i32, i32
  }
  func.func @transform_4(%arg0: i32, %arg1: i32) -> (i32, i32) {
    %c0_i32 = arith.constant 0 : i32
    %c0_i32_0 = arith.constant 0 : i32
    return %c0_i32, %arg1 : i32, i32
  }
  func.func @transform_5(%arg0: i32, %arg1: i32) -> (i32, i32) {
    %c0_i32 = arith.constant 0 : i32
    return %arg0, %arg1 : i32, i32
  }
}

module attributes {stable_mosaic.version = 11 : i64} {
  func.func @_mlm_pred_kernel(%arg0: i32, %arg1: i32, %arg2: memref<16x32xf32, #tpu.memory_space<vmem>>, %arg3: memref<32x128xf32, #tpu.memory_space<vmem>>, %arg4: memref<1x128xf32, #tpu.memory_space<vmem>>, %arg5: memref<128x128xf32, #tpu.memory_space<vmem>>, %arg6: memref<1x128xf32, #tpu.memory_space<vmem>>, %arg7: memref<16x128xf32, #tpu.memory_space<vmem>>, %arg8: memref<16x128xf32, #tpu.memory_space<vmem>>) attributes {dimension_semantics = [#tpu.dimension_semantics<parallel>, #tpu.dimension_semantics<arbitrary>], iteration_bounds = array<i64: 1, 1>, scalar_prefetch = 0 : i64, scratch_operands = 1 : i64, tpu.core_type = #tpu.core_type<tc>, window_params = [{transform_indices = @transform_0, window_bounds = array<i64: 16, 32>}, {pipeline_mode = #tpu.pipeline_mode<synchronous>, transform_indices = @transform_1, window_bounds = array<i64: 32, 128>}, {pipeline_mode = #tpu.pipeline_mode<synchronous>, transform_indices = @transform_2, window_bounds = array<i64: 1, 128>}, {transform_indices = @transform_3, window_bounds = array<i64: 128, 128>}, {transform_indices = @transform_4, window_bounds = array<i64: 1, 128>}, {transform_indices = @transform_5, window_bounds = array<i64: 16, 128>}]} {
    %c0_i32 = arith.constant 0 : i32
    %0 = arith.cmpi eq, %arg1, %c0_i32 : i32
    %1 = arith.extui %0 : i1 to i32
    %c0_i32_0 = arith.constant 0 : i32
    %2 = arith.cmpi ne, %1, %c0_i32_0 : i32
    scf.if %2 {
      %c0_8 = arith.constant 0 : index
      %c0_9 = arith.constant 0 : index
      %10 = vector.load %arg2[%c0_8, %c0_9] : memref<16x32xf32, #tpu.memory_space<vmem>>, vector<16x32xf32>
      %c0_10 = arith.constant 0 : index
      %c0_11 = arith.constant 0 : index
      %11 = vector.load %arg3[%c0_10, %c0_11] : memref<32x128xf32, #tpu.memory_space<vmem>>, vector<32x128xf32>
      %cst_12 = arith.constant dense<0.000000e+00> : vector<16x128xf32>
      %12 = tpu.matmul %10, %11, %cst_12 {dimension_numbers = #tpu.dot_dimension_numbers<[1], [0], [0], [1], [0, 0, 1, 1], [], []>} : vector<16x32xf32>, vector<32x128xf32>, vector<16x128xf32> -> vector<16x128xf32>
      %c0_13 = arith.constant 0 : index
      %c0_14 = arith.constant 0 : index
      %13 = vector.load %arg4[%c0_13, %c0_14] : memref<1x128xf32, #tpu.memory_space<vmem>>, vector<1x128xf32>
      %14 = vector.broadcast %13 : vector<1x128xf32> to vector<16x128xf32>
      %15 = arith.addf %12, %14 : vector<16x128xf32>
      %16 = math.tanh %15 : vector<16x128xf32>
      %c0_15 = arith.constant 0 : index
      %c0_16 = arith.constant 0 : index
      %17 = vector.load %arg8[%c0_15, %c0_16] : memref<16x128xf32, #tpu.memory_space<vmem>>, vector<16x128xf32>
      tpu.vector_store %arg8[%c0_15, %c0_16], %16 {strides = array<i32>} : memref<16x128xf32, #tpu.memory_space<vmem>>, vector<16x128xf32>,
    } else {
    }
    %c0 = arith.constant 0 : index
    %c0_1 = arith.constant 0 : index
    %3 = vector.load %arg8[%c0, %c0_1] : memref<16x128xf32, #tpu.memory_space<vmem>>, vector<16x128xf32>
    %c0_2 = arith.constant 0 : index
    %c0_3 = arith.constant 0 : index
    %4 = vector.load %arg5[%c0_2, %c0_3] : memref<128x128xf32, #tpu.memory_space<vmem>>, vector<128x128xf32>
    %cst = arith.constant dense<0.000000e+00> : vector<16x128xf32>
    %5 = tpu.matmul %3, %4, %cst {dimension_numbers = #tpu.dot_dimension_numbers<[1], [0], [0], [1], [0, 0, 1, 1], [], []>} : vector<16x128xf32>, vector<128x128xf32>, vector<16x128xf32> -> vector<16x128xf32>
    %c0_4 = arith.constant 0 : index
    %c0_5 = arith.constant 0 : index
    %6 = vector.load %arg6[%c0_4, %c0_5] : memref<1x128xf32, #tpu.memory_space<vmem>>, vector<1x128xf32>
    %7 = vector.broadcast %6 : vector<1x128xf32> to vector<16x128xf32>
    %8 = arith.addf %5, %7 : vector<16x128xf32>
    %c0_6 = arith.constant 0 : index
    %c0_7 = arith.constant 0 : index
    %9 = vector.load %arg7[%c0_6, %c0_7] : memref<16x128xf32, #tpu.memory_space<vmem>>, vector<16x128xf32>
    tpu.vector_store %arg7[%c0_6, %c0_7], %8 {strides = array<i32>} : memref<16x128xf32, #tpu.memory_space<vmem>>, vector<16x128xf32>,
    return
  }
  func.func @transform_0(%arg0: i32, %arg1: i32) -> (i32, i32) {
    %c0_i32 = arith.constant 0 : i32
    %c0_i32_0 = arith.constant 0 : i32
    return %arg0, %c0_i32 : i32, i32
  }
  func.func @transform_1(%arg0: i32, %arg1: i32) -> (i32, i32) {
    %c0_i32 = arith.constant 0 : i32
    %c0_i32_0 = arith.constant 0 : i32
    %c0_i32_1 = arith.constant 0 : i32
    return %c0_i32, %c0_i32_0 : i32, i32
  }
  func.func @transform_2(%arg0: i32, %arg1: i32) -> (i32, i32) {
    %c0_i32 = arith.constant 0 : i32
    %c0_i32_0 = arith.constant 0 : i32
    %c0_i32_1 = arith.constant 0 : i32
    return %c0_i32, %c0_i32_0 : i32, i32
  }
  func.func @transform_3(%arg0: i32, %arg1: i32) -> (i32, i32) {
    %c0_i32 = arith.constant 0 : i32
    %c0_i32_0 = arith.constant 0 : i32
    return %c0_i32, %arg1 : i32, i32
  }
  func.func @transform_4(%arg0: i32, %arg1: i32) -> (i32, i32) {
    %c0_i32 = arith.constant 0 : i32
    %c0_i32_0 = arith.constant 0 : i32
    return %c0_i32, %arg1 : i32, i32
  }
  func.func @transform_5(%arg0: i32, %arg1: i32) -> (i32, i32) {
    %c0_i32 = arith.constant 0 : i32
    return %arg0, %arg1 : i32, i32
  }
}

</mosaic_0001>

<bundles_post_ra>
// kernel: tpu_custom_call.1
= control target key start
LH: loop header
LB: loop body
LE: loop exit
PB: predicated region body
PF: predicated region fallthrough
CT: control target
= control target key end

     0   :  { %10 = vsyncpa [#allocation4], 0  ;;  %s614_s0 = inlined_call_operand.hbm [shape: f32[16,32], index: 0, kind: input, shape index: {}]   ;;  %s615_s1 = inlined_call_operand.hbm [shape: f32[32,128], index: 1, kind: input, shape index: {}]   ;;  %s616_s2 = inlined_call_operand.vmem [shape: f32[1,128], index: 2, kind: input, shape index: {}]   ;;  %s617_s3 = inlined_call_operand.hbm [shape: f32[128,128], index: 3, kind: input, shape index: {}]   ;;  %s618_s4 = inlined_call_operand.vmem [shape: f32[1,128], index: 4, kind: input, shape index: {}]   ;;  %s619_s5 = inlined_call_operand.hbm [shape: f32[16,128], index: 5, kind: output, shape index: {}]  }
   0x1   :  { %11 = vsyncpa [#allocation7], 0 }
   0x2   :  { %12 = vsyncpa [#allocation5], 0  ;;  %s503_s18 = smov [#allocation6]   ;;  %s504_s20 = smov [#allocation3]  }
   0x3   :  { %s30_s19 = sshll.u32 %s503_s18, 4  ;;  %s18_s21 = sshll.u32 %s504_s20, 4  ;;  %s31_s19 = int_to_ptr.vmem [resolvable:$true] %s30_s19  ;;  %s539_s21 = int_to_ptr.vmem [resolvable:$true] %s18_s21 }
   0x4   :  { %s409_s24 = scalar_lea.hbm %s615_s1, 512 }
   0x5   :  { %p410_p0 = scmp.ne.s32.totalorder %s615_s1, %s409_s24  ;;  %p413_p1 = scmp.lt.u32.totalorder %s409_s24, %s615_s1 }
   0x7   :  { %p415_p2 = pnand %p413_p1, %p410_p0 }
   0x9   :  { %418 = shalt.err (!%p415_p2)
}
   0xa   :  { %s419_s29 = scalar_lea.vmem %s31_s19, 512  ;;  %p424_p4 = scmp.lt.s32.totalorder %s31_s19, %s31_s19 }
   0xb   :  { %p420_p3 = scmp.ne.s32.totalorder %s31_s19, %s419_s29  ;;  %p425_p5 = scmp.lt.s32.totalorder %s419_s29, %s419_s29 }
   0xd   :  { %p426_p6 = por %p425_p5, %p424_p4 }
   0xf   :  { %p427_p7 = pnand %p426_p6, %p420_p3 }
  0x11   :  { %430 = shalt.err (!%p427_p7)
}
  0x12   :  { %s505_s30 = smov 128   ;;  %s506_s6 = smov 8  }
  0x13   :  { %36 = dma.hbm_to_vmem [thread:$0]  %s615_s1, 512, %s31_s19, [#allocation7], %s505_s30, %s505_s30, %s506_s6  }
  0x14   :  { %s431_s11 = scalar_lea.hbm %s614_s0, 256 }
  0x15   :  { %p432_p8 = scmp.ne.s32.totalorder %s614_s0, %s431_s11  ;;  %p435_p9 = scmp.lt.u32.totalorder %s431_s11, %s614_s0 }
  0x17   :  { %p437_p10 = pnand %p435_p9, %p432_p8 }
  0x19   :  { %440 = shalt.err (!%p437_p10)
}
  0x1a   :  { %s441_s16 = scalar_lea.vmem %s539_s21, 256  ;;  %p446_p12 = scmp.lt.s32.totalorder %s539_s21, %s539_s21 }
  0x1b   :  { %p442_p11 = scmp.ne.s32.totalorder %s539_s21, %s441_s16  ;;  %p447_p13 = scmp.lt.s32.totalorder %s441_s16, %s441_s16 }
  0x1d   :  { %p448_p0 = por %p447_p13, %p446_p12 }
  0x1f   :  { %p449_p1 = pnand %p448_p0, %p442_p11 }
  0x21   :  { %452 = shalt.err (!%p449_p1)
}
  0x22   :  { %24 = dma.hbm_to_vmem [thread:$0]  %s614_s0, 256, %s539_s21, [#allocation4], %s505_s30, %s505_s30, %s506_s6  }
  0x23   :  { %s507_s18 = smov [#allocation8]   ;;  %s453_s23 = scalar_lea.hbm %s617_s3, 2048 }
  0x24   :  { %s44_s19 = sshll.u32 %s507_s18, 4  ;;  %p454_p2 = scmp.ne.s32.totalorder %s617_s3, %s453_s23  ;;  %s45_s19 = int_to_ptr.vmem [resolvable:$true] %s44_s19 }
  0x25   :  { %p457_p3 = scmp.lt.u32.totalorder %s453_s23, %s617_s3 }
  0x27   :  { %p459_p4 = pnand %p457_p3, %p454_p2 }
  0x29   :  { %462 = shalt.err (!%p459_p4)
}
  0x2a   :  { %s463_s28 = scalar_lea.vmem %s45_s19, 2048  ;;  %p468_p6 = scmp.lt.s32.totalorder %s45_s19, %s45_s19 }
  0x2b   :  { %p464_p5 = scmp.ne.s32.totalorder %s45_s19, %s463_s28  ;;  %p469_p7 = scmp.lt.s32.totalorder %s463_s28, %s463_s28 }
  0x2d   :  { %p470_p8 = por %p469_p7, %p468_p6 }
  0x2f   :  { %p471_p9 = pnand %p470_p8, %p464_p5 }
  0x31   :  { %474 = shalt.err (!%p471_p9)
}
  0x32   :  { %50 = dma.hbm_to_vmem [thread:$0]  %s617_s3, 2048, %s45_s19, [#allocation7], %s505_s30, %s505_s30, %s506_s6  }
  0x33   :  { %497 = dma.done.wait [#allocation4], 256  }
  0x34   :  { %498 = vsyncadd [#allocation4], 4294967040 }
  0x35   :  { %499 = dma.done.wait [#allocation7], 2560  }
  0x36   :  { %500 = vsyncadd [#allocation7], 4294964736  ;;  %vm79_vm0 = vcmask 261120   ;;  %v68_v0 = vld [vmem:[#allocation6] sm:$0xff]  ;;  %v69_v1 = vld [vmem:[#allocation6 + $0x8] sm:$0xff]  ;;  %s508_s9 = smov [#allocation9]  }
  0x37   :  { %v70_v2 = vld [vmem:[#allocation6 + $0x10] sm:$0xff]  ;;  %v359_v3 = vpack.c.bf16 %v69_v1, %v68_v0  ;;  %v71_v4 = vld [vmem:[#allocation6 + $0x18] sm:$0xff]  ;;  %v167_v7 = vld [vmem:[#allocation8] sm:$0xff]  ;;  %s272_s10 = sshll.u32 %s508_s9, 4  ;;  %s273_s10 = int_to_ptr.vmem [resolvable:$true] %s272_s10 }
  0x38   :  { %v66_v5 = vld [vmem:[#allocation3] sm:$0xff]  ;;  %v363_v6 = vpack.c.bf16 %v71_v4, %v70_v2  ;;  %v168_v8 = vld [vmem:[#allocation8 + $0x8] sm:$0xff]  ;;  %v170_v11 = vld [vmem:[#allocation8 + $0x18] sm:$0xff]  ;;  %p480_p11 = scmp.lt.s32.totalorder %s273_s10, %s273_s10 }
  0x39   :  { %321 = vmatprep.mubr.msk.f32.mxu0 %vm79_vm0, %v66_v5  ;;  %v169_v9 = vld [vmem:[#allocation8 + $0x10] sm:$0xff]  ;;  %360 = vmatprep.subr.bf16.mxu0 %v359_v3  ;;  %v367_v10 = vpack.c.bf16 %v168_v8, %v167_v7  ;;  %v171_v13 = vld [vmem:[#allocation8 + $0x20] sm:$0xff]  ;;  %v172_v14 = vld [vmem:[#allocation8 + $0x28] sm:$0xff] }
  0x3a   :  { %362 = vmatpush3.bf16.msra.mxu0 %v359_v3  ;;  %v371_v12 = vpack.c.bf16 %v170_v11, %v169_v9  ;;  %v375_v15 = vpack.c.bf16 %v172_v14, %v171_v13  ;;  %v67_v16 = vld [vmem:[#allocation3 + $0x8] sm:$0xff]  ;;  %v173_v17 = vld [vmem:[#allocation8 + $0x30] sm:$0xff]  ;;  %v175_v20 = vld [vmem:[#allocation8 + $0x40] sm:$0xff] }
  0x3b   :  { %364 = vmatprep.subr.bf16.mxu0 %v363_v6  ;;  %368 = vmatprep.subr.bf16.mxu1 %v367_v10  ;;  %v174_v18 = vld [vmem:[#allocation8 + $0x38] sm:$0xff]  ;;  %v176_v21 = vld [vmem:[#allocation8 + $0x48] sm:$0xff]  ;;  %v177_v23 = vld [vmem:[#allocation8 + $0x50] sm:$0xff] }
  0x3c   :  { %370 = vmatpush3.bf16.msra.mxu1 %v367_v10  ;;  %v379_v19 = vpack.c.bf16 %v174_v18, %v173_v17  ;;  %v383_v22 = vpack.c.bf16 %v176_v21, %v175_v20  ;;  %v178_v24 = vld [vmem:[#allocation8 + $0x58] sm:$0xff]  ;;  %v179_v26 = vld [vmem:[#allocation8 + $0x60] sm:$0xff]  ;;  %v180_v27 = vld [vmem:[#allocation8 + $0x68] sm:$0xff] }
  0x3d   :  { %372 = vmatprep.subr.bf16.mxu1 %v371_v12  ;;  %v387_v25 = vpack.c.bf16 %v178_v24, %v177_v23  ;;  %v181_v28 = vld [vmem:[#allocation8 + $0x70] sm:$0xff]  ;;  %v391_v29 = vpack.c.bf16 %v180_v27, %v179_v26  ;;  %v182_v30 = vld [vmem:[#allocation8 + $0x78] sm:$0xff] }
  0x3e   :  { %366 = vmatpush3.bf16.msra.mxu0 %v363_v6  ;;  %v395_v31 = vpack.c.bf16 %v182_v30, %v181_v28  ;;  %v285_v32 = vld [vmem:[%s616_s2] ss:$0 sm:$0xff]  ;;  %s475_s2 = scalar_lea.vmem %s273_s10, 256 }
  0x3f   :  { %v288_v39 = vld [vmem:[%s618_s4] ss:$0 sm:$0xff]  ;;  %p476_p10 = scmp.ne.s32.totalorder %s273_s10, %s475_s2  ;;  %p481_p12 = scmp.lt.s32.totalorder %s475_s2, %s475_s2 }
  0x40   :  { %374 = vmatpush3.bf16.msra.mxu1 %v371_v12 }
  0x41   :  { %322 = vmatmul.mubr.msk.f32.vlgmr.msra.gmra.mrb[0].mxu0 %vm79_vm0, %v67_v16  ;;  %376 = vmatprep.subr.bf16.mxu1 %v375_v15  ;;  %p482_p13 = por %p481_p12, %p480_p11 }
  0x43   :  { %p483_p0 = pnand %p482_p13, %p476_p10 }
  0x44   :  { %378 = vmatpush3.bf16.msra.mxu1 %v375_v15 }
  0x45   :  { %380 = vmatprep.subr.bf16.mxu1 %v379_v19 }
  0x48   :  { %382 = vmatpush3.bf16.msra.mxu1 %v379_v19 }
  0x49   :  { %384 = vmatprep.subr.bf16.mxu1 %v383_v22 }
  0x4c   :  { %386 = vmatpush3.bf16.msra.mxu1 %v383_v22 }
  0x4d   :  { %388 = vmatprep.subr.bf16.mxu1 %v387_v25 }
  0x50   :  { %390 = vmatpush3.bf16.msra.mxu1 %v387_v25 }
  0x51   :  { %392 = vmatprep.subr.bf16.mxu1 %v391_v29 }
  0x54   :  { %394 = vmatpush3.bf16.msra.mxu1 %v391_v29 }
  0x55   :  { %396 = vmatprep.subr.bf16.mxu1 %v395_v31 }
  0x58   :  { %398 = vmatpush3.bf16.msra.mxu1 %v395_v31 }
 0x114   :  { %v323_v33 = vpop.f32.mrb[0].mxu0 }
 0x115   :  { %v158_v34 = vadd.f32 %v323_v33, %v285_v32  ;;  %v152_v35 = vpop.f32.mrb[1].mxu0 }
 0x116   :  { %v153_v36 = vadd.f32 %v285_v32, %v152_v35 }
 0x118   :  { %405 = vtanh.f32 %v153_v36 }
 0x119   :  { %407 = vtanh.f32 %v158_v34 }
 0x122   :  { %v406_v37 = vpop.eup %405 }
 0x123   :  { %v408_v38 = vpop.eup %407  ;;  %356 = vmatprep.mubr.f32.mxu1 %v406_v37 }
 0x124   :  { %357 = vmatmul.mubr.f32.vlgmr.msra.gmra.mrb[0].mxu1 %v408_v38 }
 0x1f7   :  { %v358_v40 = vpop.f32.mrb[0].mxu1 }
 0x1f8   :  { %v262_v41 = vadd.f32 %v358_v40, %v288_v39  ;;  %v256_v42 = vpop.f32.mrb[1].mxu1 }
 0x1f9   :  { %v257_v43 = vadd.f32 %v288_v39, %v256_v42 }
 0x1fa   :  { %266 = vst [vmem:[#allocation9 + $0x8] sm:$0xff] %v262_v41 }
 0x1fb   :  { %265 = vst [vmem:[#allocation9] sm:$0xff] %v257_v43 }
 0x1fc   :  { %486 = shalt.err (!%p483_p0)
}
 0x1fd   :  { %s487_s4 = scalar_lea.hbm %s619_s5, 256 }
 0x1fe   :  { %p488_p1 = scmp.ne.s32.totalorder %s619_s5, %s487_s4  ;;  %p491_p2 = scmp.lt.u32.totalorder %s487_s4, %s619_s5 }
 0x200   :  { %p493_p3 = pnand %p491_p2, %p488_p1 }
 0x202   :  { %496 = shalt.err (!%p493_p3)
}
 0x203   :  { %278 = dma.vmem_to_hbm [thread:$0]  %s273_s10, 256, %s619_s5, [#allocation5], %s505_s30, %s505_s30, %s506_s6  }
 0x204   :  { %501 = dma.done.wait [#allocation5], 256  }
 0x205   :  { %502 = vsyncadd [#allocation5], 4294967040 }
 0x206   :  { %282 = vsyncpa [#allocation4], 1 }
 0x207   :  { %283 = vsyncpa [#allocation7], 1 }
 0x208   :  { %284 = vsyncpa [#allocation5], 1 }

// kernel: tpu_custom_call.1
= control target key start
LH: loop header
LB: loop body
LE: loop exit
PB: predicated region body
PF: predicated region fallthrough
CT: control target
= control target key end

     0   :  { %10 = vsyncpa [#allocation4], 0  ;;  %s614_s0 = inlined_call_operand.hbm [shape: f32[16,32], index: 0, kind: input, shape index: {}]   ;;  %s615_s1 = inlined_call_operand.hbm [shape: f32[32,128], index: 1, kind: input, shape index: {}]   ;;  %s616_s2 = inlined_call_operand.vmem [shape: f32[1,128], index: 2, kind: input, shape index: {}]   ;;  %s617_s3 = inlined_call_operand.hbm [shape: f32[128,128], index: 3, kind: input, shape index: {}]   ;;  %s618_s4 = inlined_call_operand.vmem [shape: f32[1,128], index: 4, kind: input, shape index: {}]   ;;  %s619_s5 = inlined_call_operand.hbm [shape: f32[16,128], index: 5, kind: output, shape index: {}]  }
   0x1   :  { %11 = vsyncpa [#allocation7], 0 }
   0x2   :  { %12 = vsyncpa [#allocation5], 0  ;;  %s503_s18 = smov [#allocation6]   ;;  %s504_s20 = smov [#allocation3]  }
   0x3   :  { %s30_s19 = sshll.u32 %s503_s18, 4  ;;  %s18_s21 = sshll.u32 %s504_s20, 4  ;;  %s31_s19 = int_to_ptr.vmem [resolvable:$true] %s30_s19  ;;  %s539_s21 = int_to_ptr.vmem [resolvable:$true] %s18_s21 }
   0x4   :  { %s409_s24 = scalar_lea.hbm %s615_s1, 512 }
   0x5   :  { %p410_p0 = scmp.ne.s32.totalorder %s615_s1, %s409_s24  ;;  %p413_p1 = scmp.lt.u32.totalorder %s409_s24, %s615_s1 }
   0x7   :  { %p415_p2 = pnand %p413_p1, %p410_p0 }
   0x9   :  { %418 = shalt.err (!%p415_p2)
}
   0xa   :  { %s419_s29 = scalar_lea.vmem %s31_s19, 512  ;;  %p424_p4 = scmp.lt.s32.totalorder %s31_s19, %s31_s19 }
   0xb   :  { %p420_p3 = scmp.ne.s32.totalorder %s31_s19, %s419_s29  ;;  %p425_p5 = scmp.lt.s32.totalorder %s419_s29, %s419_s29 }
   0xd   :  { %p426_p6 = por %p425_p5, %p424_p4 }
   0xf   :  { %p427_p7 = pnand %p426_p6, %p420_p3 }
  0x11   :  { %430 = shalt.err (!%p427_p7)
}
  0x12   :  { %s505_s30 = smov 128   ;;  %s506_s6 = smov 8  }
  0x13   :  { %36 = dma.hbm_to_vmem [thread:$0]  %s615_s1, 512, %s31_s19, [#allocation7], %s505_s30, %s505_s30, %s506_s6  }
  0x14   :  { %s431_s11 = scalar_lea.hbm %s614_s0, 256 }
  0x15   :  { %p432_p8 = scmp.ne.s32.totalorder %s614_s0, %s431_s11  ;;  %p435_p9 = scmp.lt.u32.totalorder %s431_s11, %s614_s0 }
  0x17   :  { %p437_p10 = pnand %p435_p9, %p432_p8 }
  0x19   :  { %440 = shalt.err (!%p437_p10)
}
  0x1a   :  { %s441_s16 = scalar_lea.vmem %s539_s21, 256  ;;  %p446_p12 = scmp.lt.s32.totalorder %s539_s21, %s539_s21 }
  0x1b   :  { %p442_p11 = scmp.ne.s32.totalorder %s539_s21, %s441_s16  ;;  %p447_p13 = scmp.lt.s32.totalorder %s441_s16, %s441_s16 }
  0x1d   :  { %p448_p0 = por %p447_p13, %p446_p12 }
  0x1f   :  { %p449_p1 = pnand %p448_p0, %p442_p11 }
  0x21   :  { %452 = shalt.err (!%p449_p1)
}
  0x22   :  { %24 = dma.hbm_to_vmem [thread:$0]  %s614_s0, 256, %s539_s21, [#allocation4], %s505_s30, %s505_s30, %s506_s6  }
  0x23   :  { %s507_s18 = smov [#allocation8]   ;;  %s453_s23 = scalar_lea.hbm %s617_s3, 2048 }
  0x24   :  { %s44_s19 = sshll.u32 %s507_s18, 4  ;;  %p454_p2 = scmp.ne.s32.totalorder %s617_s3, %s453_s23  ;;  %s45_s19 = int_to_ptr.vmem [resolvable:$true] %s44_s19 }
  0x25   :  { %p457_p3 = scmp.lt.u32.totalorder %s453_s23, %s617_s3 }
  0x27   :  { %p459_p4 = pnand %p457_p3, %p454_p2 }
  0x29   :  { %462 = shalt.err (!%p459_p4)
}
  0x2a   :  { %s463_s28 = scalar_lea.vmem %s45_s19, 2048  ;;  %p468_p6 = scmp.lt.s32.totalorder %s45_s19, %s45_s19 }
  0x2b   :  { %p464_p5 = scmp.ne.s32.totalorder %s45_s19, %s463_s28  ;;  %p469_p7 = scmp.lt.s32.totalorder %s463_s28, %s463_s28 }
  0x2d   :  { %p470_p8 = por %p469_p7, %p468_p6 }
  0x2f   :  { %p471_p9 = pnand %p470_p8, %p464_p5 }
  0x31   :  { %474 = shalt.err (!%p471_p9)
}
  0x32   :  { %50 = dma.hbm_to_vmem [thread:$0]  %s617_s3, 2048, %s45_s19, [#allocation7], %s505_s30, %s505_s30, %s506_s6  }
  0x33   :  { %497 = dma.done.wait [#allocation4], 256  }
  0x34   :  { %498 = vsyncadd [#allocation4], 4294967040 }
  0x35   :  { %499 = dma.done.wait [#allocation7], 2560  }
  0x36   :  { %500 = vsyncadd [#allocation7], 4294964736  ;;  %vm79_vm0 = vcmask 261120   ;;  %v68_v0 = vld [vmem:[#allocation6] sm:$0xff]  ;;  %v69_v1 = vld [vmem:[#allocation6 + $0x8] sm:$0xff]  ;;  %s508_s9 = smov [#allocation9]  }
  0x37   :  { %v70_v2 = vld [vmem:[#allocation6 + $0x10] sm:$0xff]  ;;  %v359_v3 = vpack.c.bf16 %v69_v1, %v68_v0  ;;  %v71_v4 = vld [vmem:[#allocation6 + $0x18] sm:$0xff]  ;;  %v167_v7 = vld [vmem:[#allocation8] sm:$0xff]  ;;  %s272_s10 = sshll.u32 %s508_s9, 4  ;;  %s273_s10 = int_to_ptr.vmem [resolvable:$true] %s272_s10 }
  0x38   :  { %v66_v5 = vld [vmem:[#allocation3] sm:$0xff]  ;;  %v363_v6 = vpack.c.bf16 %v71_v4, %v70_v2  ;;  %v168_v8 = vld [vmem:[#allocation8 + $0x8] sm:$0xff]  ;;  %v170_v11 = vld [vmem:[#allocation8 + $0x18] sm:$0xff]  ;;  %p480_p11 = scmp.lt.s32.totalorder %s273_s10, %s273_s10 }
  0x39   :  { %321 = vmatprep.mubr.msk.f32.mxu0 %vm79_vm0, %v66_v5  ;;  %v169_v9 = vld [vmem:[#allocation8 + $0x10] sm:$0xff]  ;;  %360 = vmatprep.subr.bf16.mxu0 %v359_v3  ;;  %v367_v10 = vpack.c.bf16 %v168_v8, %v167_v7  ;;  %v171_v13 = vld [vmem:[#allocation8 + $0x20] sm:$0xff]  ;;  %v172_v14 = vld [vmem:[#allocation8 + $0x28] sm:$0xff] }
  0x3a   :  { %362 = vmatpush3.bf16.msra.mxu0 %v359_v3  ;;  %v371_v12 = vpack.c.bf16 %v170_v11, %v169_v9  ;;  %v375_v15 = vpack.c.bf16 %v172_v14, %v171_v13  ;;  %v67_v16 = vld [vmem:[#allocation3 + $0x8] sm:$0xff]  ;;  %v173_v17 = vld [vmem:[#allocation8 + $0x30] sm:$0xff]  ;;  %v175_v20 = vld [vmem:[#allocation8 + $0x40] sm:$0xff] }
  0x3b   :  { %364 = vmatprep.subr.bf16.mxu0 %v363_v6  ;;  %368 = vmatprep.subr.bf16.mxu1 %v367_v10  ;;  %v174_v18 = vld [vmem:[#allocation8 + $0x38] sm:$0xff]  ;;  %v176_v21 = vld [vmem:[#allocation8 + $0x48] sm:$0xff]  ;;  %v177_v23 = vld [vmem:[#allocation8 + $0x50] sm:$0xff] }
  0x3c   :  { %370 = vmatpush3.bf16.msra.mxu1 %v367_v10  ;;  %v379_v19 = vpack.c.bf16 %v174_v18, %v173_v17  ;;  %v383_v22 = vpack.c.bf16 %v176_v21, %v175_v20  ;;  %v178_v24 = vld [vmem:[#allocation8 + $0x58] sm:$0xff]  ;;  %v179_v26 = vld [vmem:[#allocation8 + $0x60] sm:$0xff]  ;;  %v180_v27 = vld [vmem:[#allocation8 + $0x68] sm:$0xff] }
  0x3d   :  { %372 = vmatprep.subr.bf16.mxu1 %v371_v12  ;;  %v387_v25 = vpack.c.bf16 %v178_v24, %v177_v23  ;;  %v181_v28 = vld [vmem:[#allocation8 + $0x70] sm:$0xff]  ;;  %v391_v29 = vpack.c.bf16 %v180_v27, %v179_v26  ;;  %v182_v30 = vld [vmem:[#allocation8 + $0x78] sm:$0xff] }
  0x3e   :  { %366 = vmatpush3.bf16.msra.mxu0 %v363_v6  ;;  %v395_v31 = vpack.c.bf16 %v182_v30, %v181_v28  ;;  %v285_v32 = vld [vmem:[%s616_s2] ss:$0 sm:$0xff]  ;;  %s475_s2 = scalar_lea.vmem %s273_s10, 256 }
  0x3f   :  { %v288_v39 = vld [vmem:[%s618_s4] ss:$0 sm:$0xff]  ;;  %p476_p10 = scmp.ne.s32.totalorder %s273_s10, %s475_s2  ;;  %p481_p12 = scmp.lt.s32.totalorder %s475_s2, %s475_s2 }
  0x40   :  { %374 = vmatpush3.bf16.msra.mxu1 %v371_v12 }
  0x41   :  { %322 = vmatmul.mubr.msk.f32.vlgmr.msra.gmra.mrb[0].mxu0 %vm79_vm0, %v67_v16  ;;  %376 = vmatprep.subr.bf16.mxu1 %v375_v15  ;;  %p482_p13 = por %p481_p12, %p480_p11 }
  0x43   :  { %p483_p0 = pnand %p482_p13, %p476_p10 }
  0x44   :  { %378 = vmatpush3.bf16.msra.mxu1 %v375_v15 }
  0x45   :  { %380 = vmatprep.subr.bf16.mxu1 %v379_v19 }
  0x48   :  { %382 = vmatpush3.bf16.msra.mxu1 %v379_v19 }
  0x49   :  { %384 = vmatprep.subr.bf16.mxu1 %v383_v22 }
  0x4c   :  { %386 = vmatpush3.bf16.msra.mxu1 %v383_v22 }
  0x4d   :  { %388 = vmatprep.subr.bf16.mxu1 %v387_v25 }
  0x50   :  { %390 = vmatpush3.bf16.msra.mxu1 %v387_v25 }
  0x51   :  { %392 = vmatprep.subr.bf16.mxu1 %v391_v29 }
  0x54   :  { %394 = vmatpush3.bf16.msra.mxu1 %v391_v29 }
  0x55   :  { %396 = vmatprep.subr.bf16.mxu1 %v395_v31 }
  0x58   :  { %398 = vmatpush3.bf16.msra.mxu1 %v395_v31 }
 0x114   :  { %v323_v33 = vpop.f32.mrb[0].mxu0 }
 0x115   :  { %v158_v34 = vadd.f32 %v323_v33, %v285_v32  ;;  %v152_v35 = vpop.f32.mrb[1].mxu0 }
 0x116   :  { %v153_v36 = vadd.f32 %v285_v32, %v152_v35 }
 0x118   :  { %405 = vtanh.f32 %v153_v36 }
 0x119   :  { %407 = vtanh.f32 %v158_v34 }
 0x122   :  { %v406_v37 = vpop.eup %405 }
 0x123   :  { %v408_v38 = vpop.eup %407  ;;  %356 = vmatprep.mubr.f32.mxu1 %v406_v37 }
 0x124   :  { %357 = vmatmul.mubr.f32.vlgmr.msra.gmra.mrb[0].mxu1 %v408_v38 }
 0x1f7   :  { %v358_v40 = vpop.f32.mrb[0].mxu1 }
 0x1f8   :  { %v262_v41 = vadd.f32 %v358_v40, %v288_v39  ;;  %v256_v42 = vpop.f32.mrb[1].mxu1 }
 0x1f9   :  { %v257_v43 = vadd.f32 %v288_v39, %v256_v42 }
 0x1fa   :  { %266 = vst [vmem:[#allocation9 + $0x8] sm:$0xff] %v262_v41 }
 0x1fb   :  { %265 = vst [vmem:[#allocation9] sm:$0xff] %v257_v43 }
 0x1fc   :  { %486 = shalt.err (!%p483_p0)
}
 0x1fd   :  { %s487_s4 = scalar_lea.hbm %s619_s5, 256 }
 0x1fe   :  { %p488_p1 = scmp.ne.s32.totalorder %s619_s5, %s487_s4  ;;  %p491_p2 = scmp.lt.u32.totalorder %s487_s4, %s619_s5 }
 0x200   :  { %p493_p3 = pnand %p491_p2, %p488_p1 }
 0x202   :  { %496 = shalt.err (!%p493_p3)
}
 0x203   :  { %278 = dma.vmem_to_hbm [thread:$0]  %s273_s10, 256, %s619_s5, [#allocation5], %s505_s30, %s505_s30, %s506_s6  }
 0x204   :  { %501 = dma.done.wait [#allocation5], 256  }
 0x205   :  { %502 = vsyncadd [#allocation5], 4294967040 }
 0x206   :  { %282 = vsyncpa [#allocation4], 1 }
 0x207   :  { %283 = vsyncpa [#allocation7], 1 }
 0x208   :  { %284 = vsyncpa [#allocation5], 1 }

</bundles_post_ra>
